<compile_context>
chip_gen: v7x
topology: tpu7x:2x2x1
jax: 0.10.0
libtpu: 0.0.40
codegen_flags: <defaults>
</compile_context>

<pallas_src>
import jax
import jax.numpy as jnp
from jax.experimental import pallas as pl
from jax.experimental.pallas import tpu as pltpu

NUM_LABELS = 2          # self.num_labels = 2
POOLING_MODE = "mean"   # pooling_mode='mean'
MNR_TEMPERATURE = 1.0   # MNRLoss(temperature=1.0)


# ----------------------------------------------------------------------------
# helpers: per-generation VMEM budget + time-tile selection
# ----------------------------------------------------------------------------
def _default_vmem_limit():
    # ~3/4 of physical VMEM: ~96 MiB on 128 MiB parts (v5e/v6e),
    # ~48 MiB on 64 MiB parts (v7x).
    try:
        cap = pltpu.get_tpu_info().vmem_capacity_bytes
    except Exception:  # not queryable -> conservative default
        cap = 128 * 1024 * 1024
    return int(max(32 << 20, min((cap * 3) // 4, 100 << 20)))


def _pick_time_block(b_blk, T, H, C, vmem_limit_bytes):
    """Largest time tile (multiple of 16 dividing T, or full T) whose
    double-buffered bf16 hidden tile fits the VMEM budget remaining after the
    resident (double-buffered) bf16 head weights, f32 biases, f32 accumulator
    scratch, labels input and the tiny epilogue outputs."""
    bf16, f32 = 2, 4
    resident = 2 * ((H * H + H * C) * bf16 + (H + C) * f32)   # weights+biases x2 bufs
    resident += b_blk * H * f32                               # acc scratch
    resident += 2 * (b_blk * C + b_blk) * f32                 # logits + loss outputs
    resident += 2 * b_blk * f32                               # labels (int32) input
    budget = max(vmem_limit_bytes - resident, vmem_limit_bytes // 4)

    def fits(tt):
        return 2 * b_blk * tt * H * bf16 <= budget            # double-buffered tile

    if fits(T):
        return T
    cands = [d for d in range(16, T, 16) if T % d == 0]
    if not cands:  # T has no multiple-of-16 divisor; fall back to 8-granularity
        cands = [d for d in range(8, T, 8) if T % d == 0]
    for d in sorted(cands, reverse=True):
        if fits(d):
            return d
    # graceful fallback: smallest candidate (may exceed budget, still compiles)
    return min(cands) if cands else T


# ----------------------------------------------------------------------------
# Kernel 1: merged_strategy('mean') + ClassificationHead + CrossEntropyLoss
# ----------------------------------------------------------------------------
def wav2vec2bert_classify(hidden_states, params, labels, *,
                          batch_block=None, time_block=None,
                          vmem_limit_bytes=None):
    """hidden_states: (B, T, H), labels: (B,) int -> (logits (B, C), scalar loss)."""
    B, T, H = hidden_states.shape
    C = NUM_LABELS

    h = hidden_states.astype(jnp.bfloat16)             # stream the big tensor as bf16
    labels2d = labels.astype(jnp.int32).reshape(B, 1)   # vectorized CE gather input
    w1 = params["w1"].astype(jnp.bfloat16)              # bf16 MXU operands,
    w2 = params["w2"].astype(jnp.bfloat16)              # f32 accumulation
    b1 = params["b1"].astype(jnp.float32).reshape(1, H)
    b2 = params["b2"].astype(jnp.float32).reshape(1, C)

    if batch_block is None:
        # >=2 batch blocks so the 'parallel' axis can shard across v7x's 2 TCs;
        # block must stay a multiple of 8 (sublane) or be the whole batch.
        half = B // 2
        batch_block = half if (B % 2 == 0 and half % 8 == 0) else B
    bB = batch_block
    assert B % bB == 0, "batch_block must divide batch"
    assert bB % 8 == 0 or bB == B, "batch_block must be a multiple of 8 (or B)"
    nB = B // bB

    if vmem_limit_bytes is None:
        vmem_limit_bytes = _default_vmem_limit()
    if time_block is None:
        time_block = _pick_time_block(bB, T, H, C, vmem_limit_bytes)
    tT = time_block
    assert T % tT == 0, "time_block must divide T"
    nT = T // tT
    inv_T = 1.0 / float(T)

    def kernel(h_ref, lab_ref, w1_ref, b1_ref, w2_ref, b2_ref,
               logits_ref, loss_ref, acc_ref):
        t = pl.program_id(1)

        @pl.when(t == 0)
        def _init():
            acc_ref[...] = jnp.zeros_like(acc_ref)

        # streaming partial time-sum, accumulated in f32
        acc_ref[...] += jnp.sum(h_ref[...].astype(jnp.float32), axis=1)

        @pl.when(t == nT - 1)
        def _finalize():
            # merged_strategy('mean')
            pooled = acc_ref[...] * inv_T                               # (bB, H) f32
            # ClassificationHead: dropout(id) -> dense -> tanh -> dropout(id) -> out_proj
            x = jnp.tanh(jnp.dot(pooled.astype(jnp.bfloat16), w1_ref[...],
                                 preferred_element_type=jnp.float32) + b1_ref[...])
            logits = jnp.dot(x.astype(jnp.bfloat16), w2_ref[...],
                             preferred_element_type=jnp.float32) + b2_ref[...]
            logits_ref[...] = logits                                    # (bB, C)

            # per-sample CrossEntropy (mean taken outside the kernel)
            m = jnp.max(logits, axis=-1, keepdims=True)
            lse = m + jnp.log(jnp.sum(jnp.exp(logits - m), axis=-1,
                                      keepdims=True))                   # (bB, 1)

            # vectorized target-logit gather: one mask + one lane reduction
            col_iota = jax.lax.broadcasted_iota(jnp.int32, (bB, C), 1)
            sel = col_iota == lab_ref[...]                               # (bB, C)
            tgt = jnp.sum(jnp.where(sel, logits, 0.0), axis=-1,
                          keepdims=True)                                 # (bB, 1)
            loss_ref[...] = lse - tgt

    # TODO(synk): at real H (~1024) the constant-index weight blocks could use
    # pipeline_mode=pl.Buffered(1) to drop the second weight buffer.
    grid_spec = pltpu.PrefetchScalarGridSpec(
        num_scalar_prefetch=0,
        grid=(nB, nT),
        in_specs=[
            pl.BlockSpec((bB, tT, H), lambda b, t: (b, t, 0)),
            pl.BlockSpec((bB, 1), lambda b, t: (b, 0)),       # labels (int32)
            pl.BlockSpec((H, H), lambda b, t: (0, 0)),        # resident weights
            pl.BlockSpec((1, H), lambda b, t: (0, 0)),
            pl.BlockSpec((H, C), lambda b, t: (0, 0)),
            pl.BlockSpec((1, C), lambda b, t: (0, 0)),
        ],
        out_specs=(
            pl.BlockSpec((bB, C), lambda b, t: (b, 0)),
            pl.BlockSpec((bB, 1), lambda b, t: (b, 0)),
        ),
        scratch_shapes=[pltpu.VMEM((bB, H), jnp.float32)],
    )

    logits, per_sample = pl.pallas_call(
        kernel,
        grid_spec=grid_spec,
        out_shape=(
            jax.ShapeDtypeStruct((B, C), jnp.float32),
            jax.ShapeDtypeStruct((B, 1), jnp.float32),
        ),
        compiler_params=pltpu.CompilerParams(
            dimension_semantics=("parallel", "arbitrary"),
            vmem_limit_bytes=vmem_limit_bytes,
        ),
    )(h, labels2d, w1, b1, w2, b2)

    return logits, jnp.mean(per_sample)


# ----------------------------------------------------------------------------
# Kernel 2: MNRLoss (cosine similarities + cross-entropy with target class 0)
# ----------------------------------------------------------------------------
def _mnr_kernel(a_ref, p_ref, n_ref, loss_ref):
    eps = 1e-8
    a = a_ref[...].astype(jnp.float32)                      # (B, D)
    p = p_ref[...].astype(jnp.float32)                      # (B, D)
    n = n_ref[...].astype(jnp.float32)                      # (B, K, D)

    a_sq = jnp.sum(a * a, axis=-1, keepdims=True)           # (B, 1)
    p_sq = jnp.sum(p * p, axis=-1, keepdims=True)           # (B, 1)
    n_sq = jnp.sum(n * n, axis=-1)                          # (B, K)

    dot_ap = jnp.sum(a * p, axis=-1, keepdims=True)         # (B, 1)
    # VPU multiply + lane reduce (no degenerate M=1 MXU matmuls)
    dot_an = jnp.sum(a[:, None, :] * n, axis=-1)            # (B, K)

    # 1 / max(||x||*||y||, eps) computed as rsqrt(max(||x||^2*||y||^2, eps^2))
    # -> EUP rsqrt, no divides, and matches torch.F.cosine_similarity clamping.
    inv_ap = jax.lax.rsqrt(jnp.maximum(a_sq * p_sq, eps * eps))   # (B, 1)
    inv_an = jax.lax.rsqrt(jnp.maximum(a_sq * n_sq, eps * eps))   # (B, K)

    inv_temp = 1.0 / MNR_TEMPERATURE
    s_ap = dot_ap * inv_ap * inv_temp                        # (B, 1)
    s_an = dot_an * inv_an * inv_temp                        # (B, K)

    # cross_entropy(cat([s_ap, s_an], 1), targets=0) without explicit concat
    m = jnp.maximum(jnp.max(s_an, axis=-1, keepdims=True), s_ap)        # (B, 1)
    sumexp = jnp.exp(s_ap - m) + jnp.sum(jnp.exp(s_an - m), axis=-1,
                                         keepdims=True)                 # (B, 1)
    lse = m + jnp.log(sumexp)                                           # (B, 1)
    loss_ref[0, 0] = jnp.mean(lse - s_ap)


def mnr_loss(anchor_emb, pos_emb, neg_embs):
    """anchor/pos: (B, D), neg_embs: (B*K, D) -> scalar loss."""
    B, D = anchor_emb.shape
    K = neg_embs.shape[0] // B
    neg3 = neg_embs.reshape(B, K, D)  # matches torch row-major anchor/negative pairing

    # TODO(synk): if B*K*D grows beyond a few MiB, add a 1-D grid over B with
    # BlockSpec tiling (bf16 streamed) instead of whole-array VMEM residency.
    loss = pl.pallas_call(
        _mnr_kernel,
        out_shape=jax.ShapeDtypeStruct((1, 1), jnp.float32),
        in_specs=[
            pl.BlockSpec(memory_space=pltpu.MemorySpace.VMEM),
            pl.BlockSpec(memory_space=pltpu.MemorySpace.VMEM),
            pl.BlockSpec(memory_space=pltpu.MemorySpace.VMEM),
        ],
        out_specs=pl.BlockSpec(memory_space=pltpu.MemorySpace.SMEM),  # scalar output
    )(anchor_emb, pos_emb, neg3)
    return loss[0, 0]


# ----------------------------------------------------------------------------
# Pure-JAX references (for correctness assertion only)
# ----------------------------------------------------------------------------
def _ref_classify(h, params, labels):
    pooled = jnp.mean(h.astype(jnp.float32), axis=1)
    x = jnp.tanh(pooled @ params["w1"].astype(jnp.float32) + params["b1"])
    logits = x @ params["w2"].astype(jnp.float32) + params["b2"]
    logp = jax.nn.log_softmax(logits, axis=-1)
    loss = -jnp.mean(jnp.take_along_axis(logp, labels[:, None], axis=1))
    return logits, loss


def _ref_mnr(a, p, n):
    B, D = a.shape
    K = n.shape[0] // B
    eps = 1e-8
    cos = lambda x, y: jnp.sum(x * y, -1) / jnp.maximum(
        jnp.linalg.norm(x, axis=-1) * jnp.linalg.norm(y, axis=-1), eps)
    s_ap = cos(a, p) / MNR_TEMPERATURE
    s_an = cos(jnp.repeat(a, K, axis=0), n).reshape(B, K) / MNR_TEMPERATURE
    logits = jnp.concatenate([s_ap[:, None], s_an], axis=1)
    logp = jax.nn.log_softmax(logits, axis=-1)
    return -jnp.mean(logp[:, 0])


if __name__ == "__main__":
    key = jax.random.PRNGKey(0)
    B, T, H = 16, 32, 64      # batch, time, hidden (small, exercises all tiling paths)
    K = 3                     # negatives per anchor
    B_MNR = 8
    k1, k2, k3, k4, k5, k6 = jax.random.split(key, 6)

    # stands in for wav2vec2bert(...).last_hidden_state, streamed by the kernel as bf16
    hidden_states = jax.random.normal(k1, (B, T, H), jnp.float32).astype(jnp.bfloat16)

    # ClassificationHead params (dense H->H, out_proj H->num_labels)
    params = {
        "w1": jax.random.normal(k2, (H, H), jnp.float32) * 0.05,
        "b1": jnp.zeros((1, H), jnp.float32),
        "w2": jax.random.normal(k3, (H, NUM_LABELS), jnp.float32) * 0.05,
        "b2": jnp.zeros((1, NUM_LABELS), jnp.float32),
    }
    labels = (jnp.arange(B) % NUM_LABELS).astype(jnp.int32)

    # --- main branch, default tiling: bB = B//2 (two parallel batch blocks for
    # v7x megacore), time tile chosen by the VMEM-aware picker ---
    classify_default = jax.jit(wav2vec2bert_classify)
    logits_d, loss_d = classify_default(hidden_states, params, labels)

    # --- main branch, explicit tiling exercising the multi-step streaming
    # time reduction (2 batch blocks x 2 time tiles) ---
    classify_tiled = jax.jit(lambda h, p, y: wav2vec2bert_classify(
        h, p, y, batch_block=8, time_block=16))
    logits_t, loss_t = classify_tiled(hidden_states, params, labels)

    # --- hybrid branch: MNRLoss on pooled embeddings ---
    anchor = jax.random.normal(k4, (B_MNR, H), jnp.float32)
    positive = jax.random.normal(k5, (B_MNR, H), jnp.float32)
    negatives = jax.random.normal(k6, (B_MNR * K, H), jnp.float32)
    mnr = jax.jit(mnr_loss)(anchor, positive, negatives)

    jax.block_until_ready((logits_d, loss_d, logits_t, loss_t, mnr))

    # correctness checks against pure-JAX f32 references (bf16-matmul tolerance)
    ref_logits, ref_loss = _ref_classify(hidden_states, params, labels)
    for lg, ls in ((logits_d, loss_d), (logits_t, loss_t)):
        assert jnp.allclose(lg, ref_logits, atol=1e-2, rtol=1e-2), "logits mismatch"
        assert jnp.allclose(ls, ref_loss, atol=1e-2, rtol=1e-2), "loss mismatch"
    ref_mnr = _ref_mnr(anchor, positive, negatives)
    assert jnp.allclose(mnr, ref_mnr, atol=1e-4, rtol=1e-4), "mnr mismatch"

    print("KERNEL_OK")
</pallas_src>

<mosaic_0001>
module attributes {stable_mosaic.version = 11 : i64} {
  func.func @kernel(%arg0: i32, %arg1: i32, %arg2: memref<8x32x64xbf16, #tpu.memory_space<vmem>>, %arg3: memref<8x1xi32, #tpu.memory_space<vmem>>, %arg4: memref<64x64xbf16, #tpu.memory_space<vmem>>, %arg5: memref<1x64xf32, #tpu.memory_space<vmem>>, %arg6: memref<64x2xbf16, #tpu.memory_space<vmem>>, %arg7: memref<1x2xf32, #tpu.memory_space<vmem>>, %arg8: memref<8x2xf32, #tpu.memory_space<vmem>>, %arg9: memref<8x1xf32, #tpu.memory_space<vmem>>, %arg10: memref<8x64xf32, #tpu.memory_space<vmem>>) attributes {dimension_semantics = [#tpu.dimension_semantics<parallel>, #tpu.dimension_semantics<arbitrary>], iteration_bounds = array<i64: 2, 1>, scalar_prefetch = 0 : i64, scratch_operands = 1 : i64, tpu.core_type = #tpu.core_type<tc>, window_params = [{transform_indices = @transform_0, window_bounds = array<i64: 8, 32, 64>}, {transform_indices = @transform_1, window_bounds = array<i64: 8, 1>}, {pipeline_mode = #tpu.pipeline_mode<synchronous>, transform_indices = @transform_2, window_bounds = array<i64: 64, 64>}, {pipeline_mode = #tpu.pipeline_mode<synchronous>, transform_indices = @transform_3, window_bounds = array<i64: 1, 64>}, {pipeline_mode = #tpu.pipeline_mode<synchronous>, transform_indices = @transform_4, window_bounds = array<i64: 64, 2>}, {pipeline_mode = #tpu.pipeline_mode<synchronous>, transform_indices = @transform_5, window_bounds = array<i64: 1, 2>}, {transform_indices = @transform_6, window_bounds = array<i64: 8, 2>}, {transform_indices = @transform_7, window_bounds = array<i64: 8, 1>}]} {
    %c0_i32 = arith.constant 0 : i32
    %0 = arith.cmpi eq, %arg1, %c0_i32 : i32
    %1 = arith.extui %0 : i1 to i32
    %c0_i32_0 = arith.constant 0 : i32
    %2 = arith.cmpi ne, %1, %c0_i32_0 : i32
    scf.if %2 {
      %cst_9 = arith.constant 0.000000e+00 : f32
      %12 = vector.broadcast %cst_9 : f32 to vector<8x64xf32>
      %c0_10 = arith.constant 0 : index
      %c0_11 = arith.constant 0 : index
      %13 = vector.load %arg10[%c0_10, %c0_11] : memref<8x64xf32, #tpu.memory_space<vmem>>, vector<8x64xf32>
      tpu.vector_store %arg10[%c0_10, %c0_11], %12 {strides = array<i32>} : memref<8x64xf32, #tpu.memory_space<vmem>>, vector<8x64xf32>,
    } else {
    }
    %c0 = arith.constant 0 : index
    %c0_1 = arith.constant 0 : index
    %3 = vector.load %arg10[%c0, %c0_1] : memref<8x64xf32, #tpu.memory_space<vmem>>, vector<8x64xf32>
    %c0_2 = arith.constant 0 : index
    %c0_3 = arith.constant 0 : index
    %c0_4 = arith.constant 0 : index
    %4 = vector.load %arg2[%c0_2, %c0_3, %c0_4] : memref<8x32x64xbf16, #tpu.memory_space<vmem>>, vector<8x32x64xbf16>
    %5 = arith.extf %4 : vector<8x32x64xbf16> to vector<8x32x64xf32>
    %cst = arith.constant dense<0.000000e+00> : vector<8x64xf32>
    %6 = vector.multi_reduction <add>, %5, %cst [1] : vector<8x32x64xf32> to vector<8x64xf32>
    %7 = arith.addf %3, %6 : vector<8x64xf32>
    %c0_5 = arith.constant 0 : index
    %c0_6 = arith.constant 0 : index
    %8 = vector.load %arg10[%c0_5, %c0_6] : memref<8x64xf32, #tpu.memory_space<vmem>>, vector<8x64xf32>
    tpu.vector_store %arg10[%c0_5, %c0_6], %7 {strides = array<i32>} : memref<8x64xf32, #tpu.memory_space<vmem>>, vector<8x64xf32>,
    %c0_i32_7 = arith.constant 0 : i32
    %9 = arith.cmpi eq, %arg1, %c0_i32_7 : i32
    %10 = arith.extui %9 : i1 to i32
    %c0_i32_8 = arith.constant 0 : i32
    %11 = arith.cmpi ne, %10, %c0_i32_8 : i32
    scf.if %11 {
      %c0_9 = arith.constant 0 : index
      %c0_10 = arith.constant 0 : index
      %12 = vector.load %arg10[%c0_9, %c0_10] : memref<8x64xf32, #tpu.memory_space<vmem>>, vector<8x64xf32>
      %cst_11 = arith.constant 3.125000e-02 : f32
      %13 = vector.broadcast %cst_11 : f32 to vector<8x64xf32>
      %14 = arith.mulf %12, %13 : vector<8x64xf32>
      %15 = arith.truncf %14 : vector<8x64xf32> to vector<8x64xbf16>
      %c0_12 = arith.constant 0 : index
      %c0_13 = arith.constant 0 : index
      %16 = vector.load %arg4[%c0_12, %c0_13] : memref<64x64xbf16, #tpu.memory_space<vmem>>, vector<64x64xbf16>
      %cst_14 = arith.constant dense<0.000000e+00> : vector<8x64xf32>
      %17 = tpu.matmul %15, %16, %cst_14 {dimension_numbers = #tpu.dot_dimension_numbers<[1], [0], [0], [1], [0, 0, 1, 1], [], []>} : vector<8x64xbf16>, vector<64x64xbf16>, vector<8x64xf32> -> vector<8x64xf32>
      %c0_15 = arith.constant 0 : index
      %c0_16 = arith.constant 0 : index
      %18 = vector.load %arg5[%c0_15, %c0_16] : memref<1x64xf32, #tpu.memory_space<vmem>>, vector<1x64xf32>
      %19 = vector.broadcast %18 : vector<1x64xf32> to vector<8x64xf32>
      %20 = arith.addf %17, %19 : vector<8x64xf32>
      %21 = math.tanh %20 : vector<8x64xf32>
      %22 = arith.truncf %21 : vector<8x64xf32> to vector<8x64xbf16>
      %c0_17 = arith.constant 0 : index
      %c0_18 = arith.constant 0 : index
      %23 = vector.load %arg6[%c0_17, %c0_18] : memref<64x2xbf16, #tpu.memory_space<vmem>>, vector<64x2xbf16>
      %cst_19 = arith.constant dense<0.000000e+00> : vector<8x2xf32>
      %24 = tpu.matmul %22, %23, %cst_19 {dimension_numbers = #tpu.dot_dimension_numbers<[1], [0], [0], [1], [0, 0, 1, 1], [], []>} : vector<8x64xbf16>, vector<64x2xbf16>, vector<8x2xf32> -> vector<8x2xf32>
      %c0_20 = arith.constant 0 : index
      %c0_21 = arith.constant 0 : index
      %25 = vector.load %arg7[%c0_20, %c0_21] : memref<1x2xf32, #tpu.memory_space<vmem>>, vector<1x2xf32>
      %26 = vector.broadcast %25 : vector<1x2xf32> to vector<8x2xf32>
      %27 = arith.addf %24, %26 : vector<8x2xf32>
      %c0_22 = arith.constant 0 : index
      %c0_23 = arith.constant 0 : index
      %28 = vector.load %arg8[%c0_22, %c0_23] : memref<8x2xf32, #tpu.memory_space<vmem>>, vector<8x2xf32>
      tpu.vector_store %arg8[%c0_22, %c0_23], %27 {strides = array<i32>} : memref<8x2xf32, #tpu.memory_space<vmem>>, vector<8x2xf32>,
      %cst_24 = arith.constant dense<0xFF800000> : vector<8xf32>
      %29 = vector.multi_reduction <maximumf>, %27, %cst_24 [1] : vector<8x2xf32> to vector<8xf32>
      %30 = vector.shape_cast %29 : vector<8xf32> to vector<8x1xf32>
      %31 = vector.broadcast %30 : vector<8x1xf32> to vector<8x2xf32>
      %32 = arith.subf %27, %31 : vector<8x2xf32>
      %33 = math.exp %32 : vector<8x2xf32>
      %cst_25 = arith.constant dense<0.000000e+00> : vector<8xf32>
      %34 = vector.multi_reduction <add>, %33, %cst_25 [1] : vector<8x2xf32> to vector<8xf32>
      %35 = vector.shape_cast %34 : vector<8xf32> to vector<8x1xf32>
      %36 = math.log %35 : vector<8x1xf32>
      %37 = arith.addf %30, %36 : vector<8x1xf32>
      %38 = tpu.iota {dimensions = array<i32: 1>} : vector<8x2xi32>
      %c0_26 = arith.constant 0 : index
      %c0_27 = arith.constant 0 : index
      %39 = vector.load %arg3[%c0_26, %c0_27] : memref<8x1xi32, #tpu.memory_space<vmem>>, vector<8x1xi32>
      %40 = vector.broadcast %39 : vector<8x1xi32> to vector<8x2xi32>
      %41 = arith.cmpi eq, %38, %40 : vector<8x2xi32>
      %cst_28 = arith.constant 0.000000e+00 : f32
      %42 = vector.broadcast %cst_28 : f32 to vector<8x2xf32>
      %43 = arith.select %41, %27, %42 : vector<8x2xi1>, vector<8x2xf32>
      %cst_29 = arith.constant dense<0.000000e+00> : vector<8xf32>
      %44 = vector.multi_reduction <add>, %43, %cst_29 [1] : vector<8x2xf32> to vector<8xf32>
      %45 = vector.shape_cast %44 : vector<8xf32> to vector<8x1xf32>
      %46 = arith.subf %37, %45 : vector<8x1xf32>
      %c0_30 = arith.constant 0 : index
      %c0_31 = arith.constant 0 : index
      %47 = vector.load %arg9[%c0_30, %c0_31] : memref<8x1xf32, #tpu.memory_space<vmem>>, vector<8x1xf32>
      tpu.vector_store %arg9[%c0_30, %c0_31], %46 {strides = array<i32>} : memref<8x1xf32, #tpu.memory_space<vmem>>, vector<8x1xf32>,
    } else {
    }
    return
  }
  func.func @transform_0(%arg0: i32, %arg1: i32) -> (i32, i32, i32) {
    %c0_i32 = arith.constant 0 : i32
    %c0_i32_0 = arith.constant 0 : i32
    return %arg0, %arg1, %c0_i32 : i32, i32, i32
  }
  func.func @transform_1(%arg0: i32, %arg1: i32) -> (i32, i32) {
    %c0_i32 = arith.constant 0 : i32
    %c0_i32_0 = arith.constant 0 : i32
    return %arg0, %c0_i32 : i32, i32
  }
  func.func @transform_2(%arg0: i32, %arg1: i32) -> (i32, i32) {
    %c0_i32 = arith.constant 0 : i32
    %c0_i32_0 = arith.constant 0 : i32
    %c0_i32_1 = arith.constant 0 : i32
    return %c0_i32, %c0_i32_0 : i32, i32
  }
  func.func @transform_3(%arg0: i32, %arg1: i32) -> (i32, i32) {
    %c0_i32 = arith.constant 0 : i32
    %c0_i32_0 = arith.constant 0 : i32
    %c0_i32_1 = arith.constant 0 : i32
    return %c0_i32, %c0_i32_0 : i32, i32
  }
  func.func @transform_4(%arg0: i32, %arg1: i32) -> (i32, i32) {
    %c0_i32 = arith.constant 0 : i32
    %c0_i32_0 = arith.constant 0 : i32
    %c0_i32_1 = arith.constant 0 : i32
    return %c0_i32, %c0_i32_0 : i32, i32
  }
  func.func @transform_5(%arg0: i32, %arg1: i32) -> (i32, i32) {
    %c0_i32 = arith.constant 0 : i32
    %c0_i32_0 = arith.constant 0 : i32
    %c0_i32_1 = arith.constant 0 : i32
    return %c0_i32, %c0_i32_0 : i32, i32
  }
  func.func @transform_6(%arg0: i32, %arg1: i32) -> (i32, i32) {
    %c0_i32 = arith.constant 0 : i32
    %c0_i32_0 = arith.constant 0 : i32
    return %arg0, %c0_i32 : i32, i32
  }
  func.func @transform_7(%arg0: i32, %arg1: i32) -> (i32, i32) {
    %c0_i32 = arith.constant 0 : i32
    %c0_i32_0 = arith.constant 0 : i32
    return %arg0, %c0_i32 : i32, i32
  }
}

</mosaic_0001>

<bundles_post_ra>
// kernel: wav2vec2bert_classify.1
= control target key start
LH: loop header
LB: loop body
LE: loop exit
PB: predicated region body
PF: predicated region fallthrough
CT: control target
= control target key end

     0   :  { %s2161_s0 = inlined_call_operand.hbm [shape: bf16[16,32,64], index: 0, kind: input, shape index: {}]   ;;  %s2162_s1 = inlined_call_operand.hbm [shape: s32[16,1], index: 1, kind: input, shape index: {}]   ;;  %s2163_s2 = inlined_call_operand.hbm [shape: bf16[64,64], index: 2, kind: input, shape index: {}]   ;;  %s2164_s3 = inlined_call_operand.hbm [shape: f32[1,64], index: 3, kind: input, shape index: {}]   ;;  %s2165_s4 = inlined_call_operand.hbm [shape: bf16[64,2], index: 4, kind: input, shape index: {}]   ;;  %s2166_s5 = inlined_call_operand.hbm [shape: f32[1,2], index: 5, kind: input, shape index: {}]   ;;  %s2167_s6 = inlined_call_operand.hbm [shape: f32[16,2], index: 6, kind: output, shape index: {0}]   ;;  %s2168_s7 = inlined_call_operand.hbm [shape: f32[16,1], index: 7, kind: output, shape index: {1}]  }
   0x1   :  { %2177 = sst [smem:[#allocation26_spill]] %s2161_s0 }
   0x2   :  { %2178 = sst [smem:[#allocation27_spill]] %s2163_s2 }
   0x3   :  { %2179 = sst [smem:[#allocation28_spill]] %s2164_s3 }
   0x4   :  { %2180 = sst [smem:[#allocation29_spill]] %s2165_s4 }
   0x5   :  { %2181 = sst [smem:[#allocation30_spill]] %s2168_s7 }
   0x6   :  { %13 = vsyncpa [#allocation4], 0 }
   0x7   :  { %15 = vsyncpa [#allocation4 + $0x1], 0 }
   0x8   :  { %16 = vsyncpa [#allocation7], 0 }
   0x9   :  { %18 = vsyncpa [#allocation7 + $0x1], 0 }
   0xa   :  { %19 = vsyncpa [#allocation10], 0 }
   0xb   :  { %20 = vsyncpa [#allocation13], 0 }
   0xc   :  { %21 = vsyncpa [#allocation5], 0 }
   0xd   :  { %23 = vsyncpa [#allocation5 + $0x1], 0 }
   0xe   :  { %24 = vsyncpa [#allocation16], 0 }
   0xf   :  { %26 = vsyncpa [#allocation16 + $0x1], 0  ;;  %s1672_s24 = smov 0   ;;  %s1674_s25 = smov 0  }
  0x10   :  { %s1676_s26 = smov 0   ;;  %s1678_s27 = smov 0  }
  0x11   :  { %s1680_s28 = smov 0   ;;  %s1682_s29 = smov 0  }
  0x12 LB: > { %2182 = sst [smem:[#allocation24_spill]] %s1597_s24  ;;  %s1703_s30 = sadd.s32 4294967295, %s1617_s29   ;;  %s1617_s29 = sphi %s1682_s29, %s32_s29   ;;  %s1613_s28 = sphi %s1680_s28, %s2216_s28   ;;  %s1609_s27 = sphi %s1678_s27, %s2215_s27   ;;  %s1605_s26 = sphi %s1676_s26, %s2214_s26   ;;  %s1601_s25 = sphi %s1674_s25, %s2213_s25   ;;  %s1597_s24 = sphi %s1672_s24, %s2212_s24  }
  0x13   : > { %s1027_s8 = sadd.s32 4294967294, %s1617_s29   ;;  %p66_p0 = scmp.ne.s32.totalorder %s1601_s25, %s1597_s24 }
  0x14   : > { %p2169_p1 = scmp.eq.s32.totalorder %s1703_s30, 0  ;;  %p206_p3 = scmp.eq.s32.totalorder %s1027_s8, 1 }
  0x15   : > { %p1028_p5 = scmp.ge.s32.totalorder %s1617_s29, 1  ;;  %p239_p7 = scmp.lt.s32.totalorder %s1617_s29, 3 }
  0x16   : > { %p1712_p4 = por %p2169_p1, %p66_p0  ;;  %p1717_p6 = por %p206_p3, %p66_p0 }
  0x17   : > { %p1722_p8 = pnand %p1028_p5, %p239_p7  ;;  %s1619_s12 = smov [#allocation8]  }
  0x18   : > { %s2183_s9 = scalar_select %p1712_p4, 1, 0 }
  0x19   : > { %s2184_s10 = scalar_select %p1717_p6, 1, 0 }
  0x1a   : > { %s2186_s11 = scalar_select %p1722_p8, 1, 0 }
  0x1b   : > { %2185 = sst [smem:[#allocation25_spill]] %s2184_s10  ;;  %s251_s13 = sshll.u32 %s1619_s12, 4  ;;  %s1726_s13 = int_to_ptr.vmem [resolvable:$true] %s251_s13 }
  0x1c   : > { %p1206_p9 = pneg %p1722_p8  ;;  %s1620_s15 = smov [#allocation9]  }
  0x1d   : > { %s265_s16 = sshll.u32 %s1620_s15, 4  ;;  %s1621_s17 = smov [#allocation11]   ;;  %s1737_s16 = int_to_ptr.vmem [resolvable:$true] %s265_s16 }
  0x1e   : > { %p1733_p11 = pnand %p1206_p9, %p2169_p1  ;;  %s1739_s18 = sshll.u32 %s1621_s17, 4  ;;  %s276_s18 = int_to_ptr.vmem [resolvable:$true] %s1739_s18 }
  0x1f   : > { %s2188_s2 = sld [smem:[#allocation27_spill]] }
  0x20   : > { %p1749_p13 = pneg %p1733_p11 }
  0x25   : > { %s1315_s21 = scalar_lea.hbm %s2188_s2, 512 }
  0x26   : > { %p1316_p12 = scmp.ne.s32.totalorder %s2188_s2, %s1315_s21  ;;  %p1322_p5 = scmp.lt.u32.totalorder %s1315_s21, %s2188_s2 }
  0x28   : > { %p1318_p0 = pnand %p1749_p13, %p1316_p12 }
  0x2a   : > { %p1319_p3 = pneg %p1318_p0 }
  0x2c   : > { %p1324_p7 = pnand %p1322_p5, %p1319_p3 }
  0x2e   : > { %1327 = shalt.err (!%p1324_p7)
}
  0x2f   : > { %s1328_s17 = scalar_lea.vmem %s1726_s13, 512  ;;  %p1336_p2 = scmp.lt.s32.totalorder %s1726_s13, %s1726_s13 }
  0x30   : > { %p1329_p9 = scmp.ne.s32.totalorder %s1726_s13, %s1328_s17  ;;  %p1337_p6 = scmp.lt.s32.totalorder %s1328_s17, %s1328_s17 }
  0x32   : > { %p1331_p10 = pnand %p1329_p9, %p1749_p13  ;;  %p1338_p12 = por %p1337_p6, %p1336_p2 }
  0x34   : > { %p1332_p1 = pneg %p1331_p10 }
  0x36   : > { %p1339_p0 = pnand %p1338_p12, %p1332_p1 }
  0x38   : > { %1342 = shalt.err (!%p1339_p0)
}
  0x39   : > { %s2175_s19 = smov 64   ;;  %s1623_s20 = smov 4  }
  0x3a   : > { %1209 = dma.hbm_to_vmem [thread:$0]  (!%p1733_p11), %s2188_s2, 512, %s1726_s13, [#allocation7], %s2175_s19, %s2175_s19, %s1623_s20  }
  0x3b   : > { %s2190_s3 = sld [smem:[#allocation28_spill]] }
  0x41   : > { %s1343_s15 = scalar_lea.hbm %s2190_s3, 16 }
  0x42   : > { %p1344_p1 = scmp.ne.s32.totalorder %s2190_s3, %s1343_s15  ;;  %p1350_p10 = scmp.lt.u32.totalorder %s1343_s15, %s2190_s3 }
  0x44   : > { %p1346_p2 = pnand %p1344_p1, %p1749_p13 }
  0x46   : > { %p1347_p6 = pneg %p1346_p2 }
  0x48   : > { %p1352_p3 = pnand %p1350_p10, %p1347_p6 }
  0x4a   : > { %1355 = shalt.err (!%p1352_p3)
}
  0x4b   : > { %s1356_s13 = scalar_lea.vmem %s1737_s16, 16  ;;  %s1363_s10 = scalar_lea.vmem %s1737_s16, 32 }
  0x4c   : > { %p1357_p5 = scmp.ne.s32.totalorder %s1737_s16, %s1356_s13  ;;  %p1364_p12 = scmp.lt.s32.totalorder %s1737_s16, %s1737_s16 }
  0x4d   : > { %p1365_p0 = scmp.lt.s32.totalorder %s1363_s10, %s1356_s13 }
  0x4e   : > { %p1359_p7 = pnand %p1357_p5, %p1749_p13 }
  0x4f   : > { %p1366_p1 = por %p1365_p0, %p1364_p12 }
  0x50   : > { %p1360_p9 = pneg %p1359_p7 }
  0x52   : > { %p1367_p2 = pnand %p1366_p1, %p1360_p9 }
  0x54   : > { %1370 = shalt.err (!%p1367_p2)
}
  0x55   : > { %1212 = dma.hbm_to_vmem [thread:$0]  (!%p1733_p11), %s2190_s3, 16, %s1737_s16, [#allocation10]  }
  0x56   : > { %s2191_s4 = sld [smem:[#allocation29_spill]] }
  0x5c   : > { %s1371_s23 = scalar_lea.hbm %s2191_s4, 512 }
  0x5d   : > { %p1372_p6 = scmp.ne.s32.totalorder %s2191_s4, %s1371_s23  ;;  %p1378_p5 = scmp.lt.u32.totalorder %s1371_s23, %s2191_s4 }
  0x5f   : > { %p1374_p10 = pnand %p1372_p6, %p1749_p13 }
  0x61   : > { %p1375_p3 = pneg %p1374_p10 }
  0x63   : > { %p1380_p7 = pnand %p1378_p5, %p1375_p3 }
  0x65   : > { %1383 = shalt.err (!%p1380_p7)
}
  0x66   : > { %s1384_s10 = scalar_lea.vmem %s276_s18, 512  ;;  %p1392_p1 = scmp.lt.s32.totalorder %s276_s18, %s276_s18 }
  0x67   : > { %p1385_p9 = scmp.ne.s32.totalorder %s276_s18, %s1384_s10  ;;  %p1393_p2 = scmp.lt.s32.totalorder %s1384_s10, %s1384_s10 }
  0x69   : > { %p1387_p12 = pnand %p1385_p9, %p1749_p13  ;;  %p1394_p4 = por %p1393_p2, %p1392_p1 }
  0x6b   : > { %p1388_p0 = pneg %p1387_p12 }
  0x6d   : > { %p1395_p8 = pnand %p1394_p4, %p1388_p0 }
  0x6f   : > { %1398 = shalt.err (!%p1395_p8)
}
  0x70   : > { %1215 = dma.hbm_to_vmem [thread:$0]  (!%p1733_p11), %s2191_s4, 512, %s276_s18, [#allocation10], %s2175_s19, %s2175_s19, %s1623_s20  }
  0x71   : > { %s1624_s24 = smov [#allocation12]   ;;  %s1399_s12 = scalar_lea.hbm %s2166_s5, 16 }
  0x72   : > { %s289_s21 = sshll.u32 %s1624_s24, 4  ;;  %p1400_p4 = scmp.ne.s32.totalorder %s2166_s5, %s1399_s12  ;;  %s290_s21 = int_to_ptr.vmem [resolvable:$true] %s289_s21 }
  0x73   : > { %p1406_p10 = scmp.lt.u32.totalorder %s1399_s12, %s2166_s5 }
  0x74   : > { %p1402_p8 = pnand %p1400_p4, %p1749_p13 }
  0x76   : > { %p1403_p6 = pneg %p1402_p8 }
  0x78   : > { %p1408_p3 = pnand %p1406_p10, %p1403_p6 }
  0x7a   : > { %1411 = shalt.err (!%p1408_p3)
}
  0x7b   : > { %s1412_s18 = scalar_lea.vmem %s290_s21, 16  ;;  %s1419_s16 = scalar_lea.vmem %s290_s21, 32 }
  0x7c   : > { %p1413_p5 = scmp.ne.s32.totalorder %s290_s21, %s1412_s18  ;;  %p1420_p12 = scmp.lt.s32.totalorder %s290_s21, %s290_s21 }
  0x7d   : > { %p1421_p0 = scmp.lt.s32.totalorder %s1419_s16, %s1412_s18 }
  0x7e   : > { %p1415_p7 = pnand %p1413_p5, %p1749_p13 }
  0x7f   : > { %p1422_p1 = por %p1421_p0, %p1420_p12 }
  0x80   : > { %p1416_p9 = pneg %p1415_p7 }
  0x82   : > { %p1423_p2 = pnand %p1422_p1, %p1416_p9 }
  0x84   : > { %1426 = shalt.err (!%p1423_p2)
}
  0x85   : > { %1218 = dma.hbm_to_vmem [thread:$0]  (!%p1733_p11), %s2166_s5, 16, %s290_s21, [#allocation13]  }
  0x86   : > { %s44_s8 = sadd.s32 1, %s1613_s28  ;;  %s53_s22 = sadd.s32 1, %s1605_s26 }
  0x87   : > { %p46_p13 = scmp.ge.s32.totalorder %s44_s8, 2  ;;  %p60_p4 = scmp.ne.s32.totalorder %s1605_s26, %s1601_s25 }
  0x88   : > { %p61_p8 = scmp.eq.s32.totalorder %s1617_s29, 0  ;;  %p1237_p6 = scmp.lt.s32.totalorder %s1617_s29, 2 }
  0x89   : > { %s2218_s8 = smov (%p46_p13, %s44_s8), 0  ;;  %p2192_p3 = scmp.eq.s32.totalorder %s1703_s30, 1 }
  0x8a   : > { %p62_p10 = por %p61_p8, %p60_p4  ;;  %s48_s23 = ssub.s32 %s1613_s28, %s2218_s8 }
  0x8b   : > { %p1847_p5 = por %p2192_p3, %p60_p4  ;;  %s1854_s12 = sand.u32 1, %s1605_s26  }
  0x8c   : > { %p51_p11 = scmp.eq.s32.totalorder %s48_s23, 0  ;;  %s1034_s21 = sshll.u32 %s1854_s12, 7 }
  0x8d   : > { %s2193_s14 = scalar_select %p1847_p5, 1, 0 }
  0x8e   : > { %s1068_s15 = sshll.u32 %s1613_s28, 11  ;;  %s2194_s0 = sld [smem:[#allocation26_spill]] }
  0x8f   : > { %s1859_s17 = scalar_select %p51_p11, %s1605_s26, %s53_s22  }
  0x90   : > { %s304_s16 = scalar_lea.vmem [#allocation3], %s1034_s21  ;;  %p1868_p7 = pnand %p1237_p6, %p62_p10 }
  0x91   : > { %s314_s7 = sshll.u32 %s304_s16, 4  ;;  %s301_s23 = scalar_lea.sflag [#allocation4], %s1854_s12  ;;  %s1872_s7 = int_to_ptr.vmem [resolvable:$true] %s314_s7 }
  0x92   : > { %p1429_p12 = pneg %p1868_p7 }
  0x94   : > { %s1864_s18 = scalar_lea.hbm %s2194_s0, %s1068_s15  ;;  %s1432_s10 = scalar_lea.hbm %s2194_s0, 4096 }
  0x95   : > { %s1427_s13 = scalar_lea.hbm %s1864_s18, 2048  ;;  %p1433_p2 = scmp.lt.u32.totalorder %s1864_s18, %s2194_s0 }
  0x96   : > { %p1428_p9 = scmp.ne.s32.totalorder %s1864_s18, %s1427_s13  ;;  %p1434_p13 = scmp.lt.u32.totalorder %s1432_s10, %s1427_s13 }
  0x97   : > { %p1436_p8 = scmp.lt.u32.totalorder %s1427_s13, %s1864_s18 }
  0x98   : > { %p1430_p0 = pnand %p1429_p12, %p1428_p9  ;;  %p1435_p4 = por %p1434_p13, %p1433_p2 }
  0x9a   : > { %p1431_p1 = pneg %p1430_p0  ;;  %p1437_p6 = por %p1436_p8, %p1435_p4 }
  0x9c   : > { %p1438_p10 = pnand %p1437_p6, %p1431_p1 }
  0x9e   : > { %1441 = shalt.err (!%p1438_p10)
}
  0x9f   : > { %s1442_s22 = scalar_lea.vmem %s1872_s7, 2048  ;;  %s1625_s21 = smov [#allocation3]  }
  0xa0   : > { %p1443_p3 = scmp.ne.s32.totalorder %s1872_s7, %s1442_s22  ;;  %s1447_s15 = sshll.u32 %s1625_s21, 4  ;;  %s1448_s15 = int_to_ptr.vmem [resolvable:$false] %s1447_s15 }
  0xa1   : > { %s1449_s19 = scalar_lea.vmem %s1448_s15, 4096  ;;  %p1450_p0 = scmp.lt.s32.totalorder %s1872_s7, %s1448_s15 }
  0xa2   : > { %p1445_p11 = pnand %p1443_p3, %p1429_p12  ;;  %p1451_p2 = scmp.lt.s32.totalorder %s1449_s19, %s1442_s22 }
  0xa4   : > { %p1446_p9 = pneg %p1445_p11  ;;  %p1452_p13 = por %p1451_p2, %p1450_p0 }
  0xa6   : > { %p1453_p4 = pnand %p1452_p13, %p1446_p9 }
  0xa8   : > { %1456 = shalt.err (!%p1453_p4)
}
  0xa9   : > { %s2196_s13 = smov 64   ;;  %s1038_s10 = sshll.u32 %s1854_s12, 3 }
  0xaa   : > { %1222 = dma.hbm_to_vmem [thread:$0]  (!%p1868_p7), %s1864_s18, 2048, %s1872_s7, %s301_s23, %s2196_s13, %s2196_s13, %s1623_s20  }
  0xab   : > { %s1039_s16 = sshll.u32 %s1613_s28, 7  ;;  %s328_s19 = scalar_lea.vmem [#allocation6], %s1038_s10 }
  0xac   : > { %s1911_s15 = scalar_lea.hbm %s2162_s1, %s1039_s16  ;;  %s335_s0 = sshll.u32 %s328_s19, 4  ;;  %s336_s0 = int_to_ptr.vmem [resolvable:$true] %s335_s0 }
  0xad   : > { %s2197_s2 = sand.u32 1, %s1617_s29   ;;  %s1457_s4 = scalar_lea.hbm %s1911_s15, 128 }
  0xae   : > { %s325_s3 = scalar_lea.sflag [#allocation7], %s2197_s2  ;;  %p1458_p1 = scmp.ne.s32.totalorder %s1911_s15, %s1457_s4 }
  0xaf   : > { %s1462_s18 = scalar_lea.hbm %s2162_s1, 256  ;;  %p1463_p10 = scmp.lt.u32.totalorder %s1911_s15, %s2162_s1 }
  0xb0   : > { %p1460_p8 = pnand %p1458_p1, %p1429_p12  ;;  %p1464_p3 = scmp.lt.u32.totalorder %s1462_s18, %s1457_s4 }
  0xb1   : > { %p1466_p9 = scmp.lt.u32.totalorder %s1457_s4, %s1911_s15 }
  0xb2   : > { %p1461_p6 = pneg %p1460_p8  ;;  %p1465_p11 = por %p1464_p3, %p1463_p10 }
  0xb4   : > { %p1467_p0 = por %p1466_p9, %p1465_p11 }
  0xb6   : > { %p1468_p2 = pnand %p1467_p0, %p1461_p6 }
  0xb8   : > { %1471 = shalt.err (!%p1468_p2)
}
  0xb9   : > { %s1472_s2 = scalar_lea.vmem %s336_s0, 128  ;;  %s1626_s13 = smov [#allocation6]  }
  0xba   : > { %p1473_p13 = scmp.ne.s32.totalorder %s336_s0, %s1472_s2  ;;  %s1477_s10 = sshll.u32 %s1626_s13, 4  ;;  %s1478_s10 = int_to_ptr.vmem [resolvable:$false] %s1477_s10 }
  0xbb   : > { %s1479_s16 = scalar_lea.vmem %s1478_s10, 256  ;;  %p1480_p8 = scmp.lt.s32.totalorder %s336_s0, %s1478_s10 }
  0xbc   : > { %p1475_p4 = pnand %p1473_p13, %p1429_p12  ;;  %p1481_p5 = scmp.lt.s32.totalorder %s1479_s16, %s1472_s2 }
  0xbe   : > { %p1476_p1 = pneg %p1475_p4  ;;  %p1482_p3 = por %p1481_p5, %p1480_p8 }
  0xc0   : > { %p1483_p10 = pnand %p1482_p3, %p1476_p1 }
  0xc2   : > { %1486 = shalt.err (!%p1483_p10)
}
  0xc3   : > { %1225 = dma.hbm_to_vmem [thread:$0]  (!%p1868_p7), %s1911_s15, 128, %s336_s0, %s325_s3  }
  0xc4   : > { %p2198_p6 = scmp.ne.s32.totalorder %s2186_s11, 0 }
  0xc5   : > { %s1937_s4 = sand.u32 (!%p2198_p6), 1, %s1601_s25   ;;  %p2199_p5 = scmp.ne.s32.totalorder (!%p2198_p6), %s2183_s9, 0 }
  0xc6   : > { %344 = sbr.rel (%p2198_p6) target bundleno = 1054 (0x41e), region = 44  ;;  %s1041_s22 = sshll.u32 (!%p2198_p6), %s1937_s4, 7 }
  0xc7   : > { %s347_s21 = scalar_lea.sflag (!%p2198_p6), [#allocation4], %s1937_s4  ;;  %s1941_s19 = scalar_lea.vmem (!%p2198_p6), [#allocation3], %s1041_s22 }
  0xcd   : > { %1568 = dma.done.wait (%p2199_p5), %s347_s21, 2048  }
  0xce   : > { %1570 = vsyncadd (%p2199_p5), %s347_s21, 4294965248  ;;  %s355_s0 = sand.u32 1, %s1703_s30   ;;  %s1949_s3 = sshll.u32 %s1937_s4, 3 }
  0xcf   : > { %s356_s11 = scalar_lea.sflag [#allocation7], %s355_s0  ;;  %s359_s24 = scalar_lea.vmem [#allocation6], %s1949_s3 }
  0xd0   : > { %1572 = dma.done.wait (%p2199_p5), %s356_s11, 128  }
  0xd1   : > { %1574 = vsyncadd (%p2199_p5), %s356_s11, 4294967168  ;;  %p2200_p7 = scmp.eq.s32.totalorder %s1703_s30, 0 }
  0xd3   : > { %1576 = dma.done.wait (%p2200_p7), [#allocation7], 512   ;;  %p2201_p12 = pmov %p2200_p7 }
  0xd4   : > { %p2202_p11 = pmov %p2200_p7 }
  0xd5   : > { %1578 = vsyncadd (%p2201_p12), [#allocation7], 4294966784 }
  0xd6   : > { %1580 = dma.done.wait (%p2202_p11), [#allocation10], 528   ;;  %p2203_p9 = pmov %p2200_p7 }
  0xd7   : > { %p2204_p0 = pmov %p2200_p7 }
  0xd8   : > { %1582 = vsyncadd (%p2203_p9), [#allocation10], 4294966768 }
  0xd9   : > { %1584 = dma.done.wait (%p2204_p0), [#allocation13], 16   ;;  %p2205_p2 = pmov %p2204_p0 }
  0xda   : > { %vm423_vm0 = vcmask 523264   ;;  %v1627_v0 = vmov 0.0   ;;  %vm1628_vm1 = vmmov 0   ;;  %v1301_v1 = vld [vmem:[#allocation8] sm:$0xff]   ;;  %v1302_v2 = vld [vmem:[#allocation8 + $0x8] sm:$0xff]   ;;  %v1303_v3 = vld [vmem:[#allocation8 + $0x10] sm:$0xff]  }
  0xdb   : > { %1586 = vsyncadd (%p2205_p2), [#allocation13], 4294967280  ;;  %1158 = vmatprep.subr.bf16.mxu0 %v1627_v0  ;;  %1166 = vmatprep.mubr.msk.bf16.mxu0 %vm1628_vm1, %v1627_v0  ;;  %424 = vst.msk [vmem:[#allocation2] sm:$0xff] %vm423_vm0, %v1627_v0  ;;  %v1070_v4 = vld [vmem:[%s1941_s19] sm:$0xff]   ;;  %v1133_v5 = vld [vmem:[%s1941_s19 + $0x8] sm:$0xff]   ;;  %vm603_vm2 = vcmask 1041409  }
  0xdc   : > { %1170 = vmatprep.subr.bf16.mxu1 %v1627_v0  ;;  %1178 = vmatprep.mubr.msk.bf16.mxu1 %vm1628_vm1, %v1627_v0  ;;  %v1071_v6 = vunpack.c.l.bf16 %v1070_v4  ;;  %v1072_v7 = vunpack.c.h.bf16 %v1070_v4  ;;  %v1075_v8 = vunpack.c.l.bf16 %v1133_v5  ;;  %v1076_v9 = vunpack.c.h.bf16 %v1133_v5  ;;  %v1134_v10 = vld [vmem:[%s1941_s19 + $0x10] sm:$0xff]   ;;  %v1135_v11 = vld [vmem:[%s1941_s19 + $0x18] sm:$0xff]   ;;  %v1136_v12 = vld [vmem:[%s1941_s19 + $0x20] sm:$0xff]   ;;  %s408_s30 = scalar_lea.vmem [#allocation14], %s1949_s3  ;;  %s1063_s9 = sshll.u32 %s1609_s27, 7 }
  0xdd   : > { %1159 = vmatpush3.bf16.msra.mxu0 %v1301_v1  ;;  %v1079_v13 = vunpack.c.l.bf16 %v1134_v10  ;;  %v1080_v14 = vunpack.c.h.bf16 %v1134_v10  ;;  %v1083_v15 = vunpack.c.l.bf16 %v1135_v11  ;;  %v1084_v16 = vunpack.c.h.bf16 %v1135_v11  ;;  %v1137_v17 = vld [vmem:[%s1941_s19 + $0x28] sm:$0xff]   ;;  %v1138_v18 = vld [vmem:[%s1941_s19 + $0x30] sm:$0xff]   ;;  %v1139_v19 = vld [vmem:[%s1941_s19 + $0x38] sm:$0xff]   ;;  %s2086_s12 = scalar_lea.hbm %s2167_s6, %s1063_s9  ;;  %s839_s18 = sshll.u32 %s408_s30, 4  ;;  %s840_s18 = int_to_ptr.vmem [resolvable:$true] %s839_s18 }
  0xde   : > { %1160 = vmatprep.subr.bf16.mxu0 %v1627_v0  ;;  %v1087_v20 = vunpack.c.l.bf16 %v1136_v12  ;;  %v1088_v21 = vunpack.c.h.bf16 %v1136_v12  ;;  %v1091_v22 = vunpack.c.l.bf16 %v1137_v17  ;;  %v1092_v23 = vunpack.c.h.bf16 %v1137_v17  ;;  %v1140_v24 = vld [vmem:[%s1941_s19 + $0x40] sm:$0xff]   ;;  %v1986_v25 = vld [vmem:[%s1941_s19 + $0x48] sm:$0xff]   ;;  %v1989_v26 = vld [vmem:[%s1941_s19 + $0x50] sm:$0xff]   ;;  %s821_s7 = scalar_lea.sflag [#allocation5], %s1937_s4  ;;  %s1487_s23 = scalar_lea.vmem %s840_s18, 128 }
  0xdf   : > { %v1095_v27 = vunpack.c.l.bf16 %v1138_v18  ;;  %v1096_v28 = vunpack.c.h.bf16 %v1138_v18  ;;  %v1099_v29 = vunpack.c.l.bf16 %v1139_v19  ;;  %v1100_v30 = vunpack.c.h.bf16 %v1139_v19  ;;  %v1992_v31 = vld [vmem:[%s1941_s19 + $0x58] sm:$0xff]   ;;  %v1995_v32 = vld [vmem:[%s1941_s19 + $0x60] sm:$0xff]   ;;  %v1998_v33 = vld [vmem:[%s1941_s19 + $0x68] sm:$0xff]   ;;  %p1488_p13 = scmp.ne.s32.totalorder %s840_s18, %s1487_s23  ;;  %p2206_p4 = scmp.ne.s32.totalorder %s2193_s14, 0 }
  0xe0   : > { %v1304_v34 = vld [vmem:[#allocation8 + $0x18] sm:$0xff]   ;;  %v1103_v35 = vunpack.c.l.bf16 %v1140_v24  ;;  %v1104_v36 = vunpack.c.h.bf16 %v1140_v24  ;;  %v1107_v37 = vunpack.c.l.bf16 %v1986_v25  ;;  %v1108_v38 = vunpack.c.h.bf16 %v1986_v25  ;;  %v2003_v39 = vld [vmem:[%s1941_s19 + $0x70] sm:$0xff]   ;;  %v2006_v40 = vld [vmem:[%s1941_s19 + $0x78] sm:$0xff]   ;;  %s1630_s2 = smov [#allocation14]  }
  0xe1   : > { %1161 = vmatpush3.bf16.msra.mxu0 %v1302_v2  ;;  %v1111_v41 = vunpack.c.l.bf16 %v1989_v26  ;;  %v1112_v42 = vunpack.c.h.bf16 %v1989_v26  ;;  %v1115_v43 = vunpack.c.l.bf16 %v1992_v31  ;;  %v1116_v44 = vunpack.c.h.bf16 %v1992_v31  ;;  %p1489_p1 = pnand %p1488_p13, %p2206_p4  ;;  %s1491_s13 = sshll.u32 %s1630_s2, 4  ;;  %s1492_s13 = int_to_ptr.vmem [resolvable:$false] %s1491_s13 }
  0xe2   : > { %1162 = vmatprep.subr.bf16.mxu0 %v1627_v0  ;;  %v1119_v45 = vunpack.c.l.bf16 %v1995_v32  ;;  %v1120_v46 = vunpack.c.h.bf16 %v1995_v32  ;;  %v1123_v47 = vunpack.c.l.bf16 %v1998_v33  ;;  %v1124_v48 = vunpack.c.h.bf16 %v1998_v33  ;;  %s1493_s10 = scalar_lea.vmem %s1492_s13, 256  ;;  %p1494_p3 = scmp.lt.s32.totalorder %s840_s18, %s1492_s13 }
  0xe3   : > { %v1127_v49 = vunpack.c.l.bf16 %v2003_v39  ;;  %v1128_v50 = vunpack.c.h.bf16 %v2003_v39  ;;  %v1131_v51 = vunpack.c.l.bf16 %v2006_v40  ;;  %v1132_v52 = vunpack.c.h.bf16 %v2006_v40  ;;  %p1490_p8 = pneg %p1489_p1  ;;  %p1495_p10 = scmp.lt.s32.totalorder %s1493_s10, %s1487_s23 }
  0xe4   : > { %v491_v53 = vsel %vm423_vm0, %v1071_v6, 0.0  ;;  %v492_v54 = vsel %vm423_vm0, %v1072_v7, 0.0  ;;  %v494_v55 = vsel %vm423_vm0, %v1075_v8, 0.0  ;;  %v496_v56 = vsel %vm423_vm0, %v1076_v9, 0.0 }
  0xe5   : > { %1163 = vmatpush3.bf16.msra.mxu0 %v1303_v3  ;;  %v493_v57 = vadd.f32 %v492_v54, %v491_v53  ;;  %v504_v58 = vsel %vm423_vm0, %v1079_v13, 0.0  ;;  %v505_v59 = vsel %vm423_vm0, %v1080_v14, 0.0  ;;  %v507_v60 = vsel %vm423_vm0, %v1083_v15, 0.0  ;;  %p1496_p6 = por %p1495_p10, %p1494_p3 }
  0xe6   : > { %1164 = vmatprep.subr.bf16.mxu0 %v1627_v0  ;;  %v506_v61 = vadd.f32 %v505_v59, %v504_v58  ;;  %v509_v62 = vsel %vm423_vm0, %v1084_v16, 0.0  ;;  %v517_v63 = vsel %vm423_vm0, %v1087_v20, 0.0  ;;  %v518_v1 = vsel %vm423_vm0, %v1088_v21, 0.0 }
  0xe7   : > { %v495_v2 = vadd.f32 %v494_v55, %v493_v57  ;;  %v519_v3 = vadd.f32 %v518_v1, %v517_v63  ;;  %v520_v4 = vsel %vm423_vm0, %v1091_v22, 0.0  ;;  %v522_v5 = vsel %vm423_vm0, %v1092_v23, 0.0  ;;  %p1497_p5 = pnand %p1496_p6, %p1490_p8 }
  0xe8   : > { %v508_v6 = vadd.f32 %v507_v60, %v506_v61  ;;  %v530_v7 = vsel %vm423_vm0, %v1095_v27, 0.0  ;;  %v531_v8 = vsel %vm423_vm0, %v1096_v28, 0.0  ;;  %v533_v9 = vsel %vm423_vm0, %v1099_v29, 0.0 }
  0xe9   : > { %1165 = vmatpush3.bf16.msra.mxu0 %v1304_v34  ;;  %v497_v10 = vadd.f32 %v496_v56, %v495_v2  ;;  %v521_v11 = vadd.f32 %v520_v4, %v519_v3  ;;  %v532_v12 = vadd.f32 %v531_v8, %v530_v7  ;;  %v535_v13 = vsel %vm423_vm0, %v1100_v30, 0.0 }
  0xea   : > { %v510_v14 = vadd.f32 %v509_v62, %v508_v6  ;;  %v543_v15 = vsel %vm423_vm0, %v1103_v35, 0.0  ;;  %v544_v16 = vsel %vm423_vm0, %v1104_v36, 0.0  ;;  %v546_v17 = vsel %vm423_vm0, %v1107_v37, 0.0 }
  0xeb   : > { %v498_v18 = vrot.slane %v497_v10, 4  ;;  %v523_v19 = vadd.f32 %v522_v5, %v521_v11  ;;  %v534_v20 = vadd.f32 %v533_v9, %v532_v12  ;;  %v545_v21 = vadd.f32 %v544_v16, %v543_v15 }
  0xec   : > { %v511_v22 = vrot.slane %v510_v14, 4  ;;  %v548_v23 = vsel %vm423_vm0, %v1108_v38, 0.0  ;;  %v556_v24 = vsel %vm423_vm0, %v1111_v41, 0.0  ;;  %v557_v25 = vsel %vm423_vm0, %v1112_v42, 0.0 }
  0xed   : > { %v499_v26 = vadd.f32 %v498_v18, %v497_v10  ;;  %v524_v27 = vrot.slane %v523_v19, 4  ;;  %v536_v28 = vadd.f32 %v535_v13, %v534_v20  ;;  %v547_v29 = vadd.f32 %v546_v17, %v545_v21 }
  0xee   : > { %v512_v30 = vadd.f32 %v511_v22, %v510_v14  ;;  %v558_v31 = vadd.f32 %v557_v25, %v556_v24  ;;  %v559_v32 = vsel %vm423_vm0, %v1115_v43, 0.0  ;;  %v561_v34 = vsel %vm423_vm0, %v1116_v44, 0.0 }
  0xef   : > { %v500_v35 = vrot.slane %v499_v26, 2  ;;  %v525_v36 = vadd.f32 %v524_v27, %v523_v19  ;;  %v537_v37 = vrot.slane %v536_v28, 4  ;;  %v549_v53 = vadd.f32 %v548_v23, %v547_v29 }
  0xf0   : > { %v513_v38 = vrot.slane %v512_v30, 2  ;;  %v560_v54 = vadd.f32 %v559_v32, %v558_v31  ;;  %v569_v41 = vsel %vm423_vm0, %v1119_v45, 0.0  ;;  %v570_v42 = vsel %vm423_vm0, %v1120_v46, 0.0 }
  0xf1   : > { %vm605_vm3 = vcmask 1042434   ;;  %v501_v55 = vadd.f32 %v500_v35, %v499_v26  ;;  %v526_v56 = vrot.slane %v525_v36, 2  ;;  %v538_v57 = vadd.f32 %v537_v37, %v536_v28  ;;  %v425_v37 = vld [vmem:[#allocation2] sm:$0xff] }
  0xf2   : > { %v550_v58 = vrot.slane %v549_v53, 4  ;;  %v514_v59 = vadd.f32 %v513_v38, %v512_v30  ;;  %v562_v43 = vadd.f32 %v561_v34, %v560_v54  ;;  %v571_v60 = vadd.f32 %v570_v42, %v569_v41 }
  0xf3   : > { %v572_v44 = vsel %vm423_vm0, %v1123_v47, 0.0  ;;  %v502_v61 = vrot.slane %v501_v55, 1  ;;  %v527_v62 = vadd.f32 %v526_v56, %v525_v36  ;;  %v539_v63 = vrot.slane %v538_v57, 2  ;;  %v1305_v56 = vld [vmem:[#allocation11] sm:$0xff]  }
  0xf4   : > { %v551_v1 = vadd.f32 %v550_v58, %v549_v53  ;;  %v515_v2 = vrot.slane %v514_v59, 1  ;;  %v563_v45 = vrot.slane %v562_v43, 4  ;;  %v573_v3 = vadd.f32 %v572_v44, %v571_v60  ;;  %1171 = vmatpush3.bf16.msra.mxu1 %v1305_v56  ;;  %v1307_v58 = vld [vmem:[#allocation11 + $0x10] sm:$0xff]  }
  0xf5   : > { %v574_v46 = vsel %vm423_vm0, %v1124_v48, 0.0  ;;  %v503_v4 = vadd.f32 %v502_v61, %v501_v55  ;;  %v528_v5 = vrot.slane %v527_v62, 1  ;;  %v540_v6 = vadd.f32 %v539_v63, %v538_v57  ;;  %1172 = vmatprep.subr.bf16.mxu1 %v1627_v0  ;;  %v1306_v57 = vld [vmem:[#allocation11 + $0x8] sm:$0xff]  }
  0xf6   : > { %v552_v7 = vrot.slane %v551_v1, 2  ;;  %v516_v8 = vadd.f32 %v515_v2, %v514_v59  ;;  %v564_v9 = vadd.f32 %v563_v45, %v562_v43  ;;  %v575_v10 = vadd.f32 %v574_v46, %v573_v3  ;;  %v1308_v59 = vld [vmem:[#allocation11 + $0x18] sm:$0xff]   ;;  %v1055_v3 = vld [vmem:[#allocation12] ss:$0 sm:$0xff] }
  0xf7   : > { %v582_v47 = vsel %vm423_vm0, %v1127_v49, 0.0  ;;  %v529_v11 = vadd.f32 %v528_v5, %v527_v62  ;;  %v541_v12 = vrot.slane %v540_v6, 1  ;;  %v583_v33 = vsel %vm423_vm0, %v1128_v50, 0.0  ;;  %v1049_v43 = vld [vmem:[#allocation9] ss:$0 sm:$0xff] }
  0xf8   : > { %v553_v13 = vadd.f32 %v552_v7, %v551_v1  ;;  %v565_v14 = vrot.slane %v564_v9, 2  ;;  %v576_v48 = vrot.slane %v575_v10, 4  ;;  %v584_v15 = vadd.f32 %v583_v33, %v582_v47  ;;  %1173 = vmatpush3.bf16.msra.mxu1 %v1306_v57 }
  0xf9   : > { %v585_v16 = vsel %vm423_vm0, %v1131_v51, 0.0  ;;  %v587_v18 = vsel %vm423_vm0, %v1132_v52, 0.0  ;;  %v604_v49 = vsel %vm603_vm2, %v516_v8, %v503_v4  ;;  %v542_v19 = vadd.f32 %v541_v12, %v540_v6  ;;  %1174 = vmatprep.subr.bf16.mxu1 %v1627_v0  ;;  %v808_v8 = vld [vmem:[%s359_s24] sm:$0xff] }
  0xfa   : > { %v554_v17 = vrot.slane %v553_v13, 1  ;;  %v566_v20 = vadd.f32 %v565_v14, %v564_v9  ;;  %v577_v21 = vadd.f32 %v576_v48, %v575_v10  ;;  %v586_v39 = vadd.f32 %v585_v16, %v584_v15 }
  0xfb   : > { %v606_v50 = vsel %vm605_vm3, %v529_v11, %v604_v49  ;;  %vm607_vm4 = vcmask 1043459   ;;  %vm609_vm5 = vcmask 1044484   ;;  %vm611_vm6 = vcmask 1045509  }
  0xfc   : > { %v567_v22 = vrot.slane %v566_v20, 1  ;;  %v578_v23 = vrot.slane %v577_v21, 2  ;;  %v588_v24 = vadd.f32 %v587_v18, %v586_v39  ;;  %v555_v25 = vadd.f32 %v554_v17, %v553_v13  ;;  %1175 = vmatpush3.bf16.msra.mxu1 %v1307_v58 }
  0xfd   : > { %v608_v27 = vsel %vm607_vm4, %v542_v19, %v606_v50  ;;  %vm613_vm7 = vcmask 1046534   ;;  %vm615_vm8 = vcmask 1047559   ;;  %1176 = vmatprep.subr.bf16.mxu1 %v1627_v0  ;;  %v1629_v45 = vmov 0  }
  0xfe   : > { %v579_v26 = vadd.f32 %v578_v23, %v577_v21  ;;  %v589_v51 = vrot.slane %v588_v24, 4  ;;  %v568_v40 = vadd.f32 %v567_v22, %v566_v20  ;;  %v610_v29 = vsel %vm609_vm5, %v555_v25, %v608_v27  ;;  %1300 = vset.pattern.permute.xlu0 %v1629_v45 }
  0xff   : > { %vm792_vm9 = vcmask 15360   ;;  %v806_v11 = vlaneseq }
 0x100   : > { %v580_v28 = vrot.slane %v579_v26, 1  ;;  %v590_v52 = vadd.f32 %v589_v51, %v588_v24  ;;  %v612_v34 = vsel %vm611_vm6, %v568_v40, %v610_v29  ;;  %1177 = vmatpush3.bf16.msra.mxu1 %v1308_v59 }
 0x101   : > { %v807_v12 = vand.u32 127, %v806_v11 }
 0x102   : > { %v591_v30 = vrot.slane %v590_v52, 2  ;;  %v581_v31 = vadd.f32 %v580_v28, %v579_v26 }
 0x104   : > { %v592_v32 = vadd.f32 %v591_v30, %v590_v52  ;;  %v614_v36 = vsel %vm613_vm7, %v581_v31, %v612_v34 }
 0x106   : > { %v593_v35 = vrot.slane %v592_v32, 1 }
 0x108   : > { %v594_v53 = vadd.f32 %v593_v35, %v592_v32 }
 0x10a   : > { %v616_v38 = vsel %vm615_vm8, %v594_v53, %v614_v36 }
 0x10b   : > { %v618_v54 = vadd.f32 %v616_v38, %v425_v37 }
 0x10d   : > { %619 = vst.msk [vmem:[#allocation2] sm:$0xff] %vm423_vm0, %v618_v54 }
 0x114   : > { %v623_v41 = vld [vmem:[#allocation2] sm:$0xff] }
 0x115   : > { %v624_v42 = vmul.f32 0.03125, %v623_v41 }
 0x117   : > { %v625_v55 = vpack.c.bf16 %v624_v42, %v624_v42 }
 0x119   : > { %1167 = vmatmul.mubr.msk.bf16.vlgmr.msra.gmra.mrb[0].mxu0 %vm423_vm0, %v625_v55 }
 0x1ec   : > { %v702_v60 = vpop.f32.mrb[0].mxu0 }
 0x1ed   : > { %v703_v44 = vadd.f32 %v1049_v43, %v702_v60  ;;  %v1168_v61 = vpop.f32.mrb[1].mxu0 }
 0x1ee   : > { %v705_v62 = vpop.f32.mrb[2].mxu0 }
 0x1ef   : > { %1309 = vtanh.f32 %v703_v44  ;;  %v1169_v63 = vpop.f32.mrb[3].mxu0 }
 0x1f9   : > { %v1310_v1 = vpop.eup %1309 }
 0x1fa   : > { %v709_v2 = vpack.c.bf16 %v1310_v1, %v1310_v1 }
 0x1fc   : > { %1179 = vmatmul.mubr.msk.bf16.vlgmr.msra.gmra.mrb[0].mxu1 %vm423_vm0, %v709_v2 }
 0x2cf   : > { %v786_v46 = vpop.f32.mrb[0].mxu1 }
 0x2d0   : > { %v787_v0 = vadd.f32 %v1055_v3, %v786_v46  ;;  %v1180_v4 = vpop.f32.mrb[1].mxu1 }
 0x2d1   : > { %v789_v5 = vpop.f32.mrb[2].mxu1 }
 0x2d2   : > { %v1181_v6 = vpop.f32.mrb[3].mxu1  ;;  %v794_v7 = vsel %vm792_vm9, %v787_v0, -inf  ;;  %793 = vst.msk [vmem:[%s408_s30] sm:$0xff] %vm792_vm9, %v787_v0 }
 0x2d3   : > { %795 = vmax.xlane.f32.xlu0 %v794_v7 }
 0x2e9   : > { %810 = vperm.xlu0 %1300, %v808_v8  }
 0x360   : > { %v796_v9 = vpop.xlane.xlu0 %795 }
 0x361   : > { %v797_v10 = vsub.f32 %v787_v0, %v796_v9 }
 0x363   : > { %v798_v47 = vmul.f32 1.442695, %v797_v10 }
 0x365   : > { %1311 = vpow2.f32 %v798_v47 }
 0x368   : > { %v811_v13 = vpop.permute.xlu0 %810 }
 0x369   : > { %vm812_vm10 = vcmp.eq.s32.totalorder %v807_v12, %v811_v13 }
 0x36a   : > { %v813_v48 = vsel %vm812_vm10, %v787_v0, 0.0 }
 0x36b   : > { %v814_v15 = vsel %vm792_vm9, %v813_v48, 0.0 }
 0x36f   : > { %v1312_v33 = vpop.eup %1311 }
 0x370   : > { %v800_v14 = vsel %vm792_vm9, %v1312_v33, 0.0 }
 0x371   : > { %801 = vadd.xlane.f32.xlu1 %v800_v14 }
 0x375   : > { %815 = vadd.xlane.f32.xlu1 %v814_v15 }
 0x376   : > { %1500 = shalt.err (!%p1497_p5)
}
 0x377   : > { %s1501_s16 = scalar_lea.hbm %s2086_s12, 128  ;;  %s1505_s19 = scalar_lea.hbm %s2167_s6, 256 }
 0x378   : > { %p1502_p7 = scmp.ne.s32.totalorder %s2086_s12, %s1501_s16  ;;  %p1506_p9 = scmp.lt.u32.totalorder %s2086_s12, %s2167_s6 }
 0x379   : > { %p1507_p0 = scmp.lt.u32.totalorder %s1505_s19, %s1501_s16  ;;  %p1509_p13 = scmp.lt.u32.totalorder %s1501_s16, %s2086_s12 }
 0x37a   : > { %p1503_p12 = pnand %p1502_p7, %p2206_p4 }
 0x37b   : > { %p1508_p2 = por %p1507_p0, %p1506_p9 }
 0x37c   : > { %p1504_p11 = pneg %p1503_p12 }
 0x37d   : > { %p1510_p1 = por %p1509_p13, %p1508_p2 }
 0x37f   : > { %p1511_p8 = pnand %p1510_p1, %p1504_p11 }
 0x381   : > { %1514 = shalt.err (!%p1511_p8)
}
 0x382   : > { %1202 = dma.vmem_to_hbm [thread:$0]  (%p2206_p4), %s840_s18, 128, %s2086_s12, %s821_s7   ;;  %vm818_vm11 = vcmask 7168  }
 0x383   : > { %s415_s24 = scalar_lea.vmem [#allocation15], %s1949_s3  ;;  %s2207_s23 = sld [smem:[#allocation30_spill]] }
 0x384   : > { %s852_s30 = sshll.u32 %s415_s24, 4  ;;  %s826_s12 = scalar_lea.sflag [#allocation16], %s1937_s4  ;;  %s2114_s30 = int_to_ptr.vmem [resolvable:$true] %s852_s30 }
 0x385   : > { %s1515_s18 = scalar_lea.vmem %s2114_s30, 128  ;;  %s1631_s3 = smov [#allocation15]  }
 0x386   : > { %p1516_p3 = scmp.ne.s32.totalorder %s2114_s30, %s1515_s18  ;;  %s1519_s7 = sshll.u32 %s1631_s3, 4  ;;  %s1520_s7 = int_to_ptr.vmem [resolvable:$false] %s1519_s7 }
 0x387   : > { %s1521_s27 = scalar_lea.vmem %s1520_s7, 256  ;;  %p1522_p5 = scmp.lt.s32.totalorder %s2114_s30, %s1520_s7 }
 0x388   : > { %p1517_p10 = pnand %p1516_p3, %p2206_p4  ;;  %p1523_p7 = scmp.lt.s32.totalorder %s1521_s27, %s1515_s18 }
 0x389   : > { %s2112_s2 = scalar_lea.hbm %s2207_s23, %s1063_s9 }
 0x38a   : > { %p1518_p6 = pneg %p1517_p10  ;;  %p1524_p12 = por %p1523_p7, %p1522_p5 }
 0x38c   : > { %p1525_p11 = pnand %p1524_p12, %p1518_p6 }
 0x3fe   : > { %v802_v16 = vpop.xlane.xlu1 %801 }
 0x3ff   : > { %1313 = vlog2.f32 %v802_v16 }
 0x402   : > { %v816_v19 = vpop.xlane.xlu1 %815 }
 0x409   : > { %v1314_v17 = vpop.eup %1313 }
 0x40a   : > { %v804_v18 = vmul.f32 0.6931472, %v1314_v17 }
 0x40c   : > { %v805_v49 = vadd.f32 %v804_v18, %v796_v9 }
 0x40e   : > { %v817_v20 = vsub.f32 %v805_v49, %v816_v19 }
 0x410   : > { %819 = vst.msk [vmem:[%s415_s24] sm:$0xff] %vm818_vm11, %v817_v20 }
 0x411   : > { %1528 = shalt.err (!%p1525_p11)
}
 0x412   : > { %s1529_s4 = scalar_lea.hbm %s2112_s2, 128  ;;  %s1533_s10 = scalar_lea.hbm %s2207_s23, 256 }
 0x413   : > { %p1530_p9 = scmp.ne.s32.totalorder %s2112_s2, %s1529_s4  ;;  %p1534_p13 = scmp.lt.u32.totalorder %s2112_s2, %s2207_s23 }
 0x414   : > { %p1535_p1 = scmp.lt.u32.totalorder %s1533_s10, %s1529_s4  ;;  %p1537_p3 = scmp.lt.u32.totalorder %s1529_s4, %s2112_s2 }
 0x415   : > { %p1531_p0 = pnand %p1530_p9, %p2206_p4 }
 0x416   : > { %p1536_p8 = por %p1535_p1, %p1534_p13 }
 0x417   : > { %p1532_p2 = pneg %p1531_p0 }
 0x418   : > { %p1538_p10 = por %p1537_p3, %p1536_p8 }
 0x41a   : > { %p1539_p6 = pnand %p1538_p10, %p1532_p2 }
 0x41c   : > { %1542 = shalt.err (!%p1539_p6)
}
 0x41d   : > { %1203 = dma.vmem_to_hbm [thread:$0]  (%p2206_p4), %s2114_s30, 128, %s2112_s2, %s826_s12  }
 0x41e PF: > { %s2208_s21 = sld [smem:[#allocation24_spill]]  ;;  %s2209_s19 = sld [smem:[#allocation25_spill]] }
 0x41f   : > { %p2211_p7 = scmp.ge.s32.totalorder %s1617_s29, 2 }
 0x424   : > { %s864_s0 = sand.u32 1, %s2208_s21   ;;  %p2210_p5 = scmp.ne.s32.totalorder %s2209_s19, 0 }
 0x425   : > { %s865_s11 = scalar_lea.sflag [#allocation5], %s864_s0 }
 0x426   : > { %p1227_p12 = pnand %p2211_p7, %p2210_p5 }
 0x428   : > { %1588 = dma.done.wait (!%p1227_p12), %s865_s11, 128  }
 0x429   : > { %1590 = vsyncadd (!%p1227_p12), %s865_s11, 4294967168  ;;  %s874_s24 = scalar_lea.sflag [#allocation16], %s864_s0 }
 0x42a   : > { %1592 = dma.done.wait (!%p1227_p12), %s874_s24, 128  }
 0x42b   : > { %1594 = vsyncadd (!%p1227_p12), %s874_s24, 4294967168  ;;  %s32_s29 = sadd.s32 1, %s1617_s29   ;;  %s2212_s24 = smov %s1601_s25 }
 0x42c   : > { %p29_p11 = scmp.ge.s32.totalorder %s32_s29, 4   ;;  %s2213_s25 = smov %s1605_s26 }
 0x42d   : > { %s2214_s26 = smov %s1859_s17  ;;  %s2215_s27 = smov %s1613_s28 }
 0x42e   : > { %s2216_s28 = smov %s2218_s8  ;;  %31 = sbr.rel (!%p29_p11) target bundleno = 18 (0x12), region = 143 }
 0x435   :  { %879 = vsyncpa [#allocation4], 1 }
 0x436   :  { %881 = vsyncpa [#allocation4 + $0x1], 1 }
 0x437   :  { %882 = vsyncpa [#allocation7], 1 }
 0x438   :  { %884 = vsyncpa [#allocation7 + $0x1], 1 }
 0x439   :  { %885 = vsyncpa [#allocation10], 1 }
 0x43a   :  { %886 = vsyncpa [#allocation13], 1 }
 0x43b   :  { %887 = vsyncpa [#allocation5], 1 }
 0x43c   :  { %889 = vsyncpa [#allocation5 + $0x1], 1 }
 0x43d   :  { %890 = vsyncpa [#allocation16], 1 }
 0x43e   :  { %892 = vsyncpa [#allocation16 + $0x1], 1 }

</bundles_post_ra>
